<compile_context>
chip_gen: v7x
topology: tpu7x:2x2x1
jax: 0.10.0
libtpu: 0.0.40
codegen_flags: <defaults>
</compile_context>

<pallas_src>
import jax
import jax.numpy as jnp
from jax.experimental import pallas as pl
from jax.experimental.pallas import tpu as pltpu

N_FEATURES = 6   # len(features) in the PyTorch module
H1 = 64
H2 = 32
H3 = 1

DEFAULT_TB = 8192  # batch tile (lane axis); sweep 4096..16384


def _round_up(n, m):
    return ((n + m - 1) // m) * m


def _pick_tiling(B, tb):
    """Pick (tile, padded_batch) with tile % 128 == 0 and an even grid >= 2."""
    tb = max(128, (tb // 128) * 128)
    b_min = _round_up(max(B, 1), 256)        # room for at least two 128-lane tiles
    if b_min <= 2 * tb:
        return b_min // 2, b_min             # exactly 2 grid steps
    b_pad = _round_up(B, 2 * tb)             # even number of steps for megacore
    return tb, b_pad


def mlp_kernel(x_ref, w1_ref, b1_ref, w2_ref, b2_ref, w3_ref, b3_ref, o_ref):
    # x : (6, tb) bf16   | w1: (64, 6)  bf16 | b1: (64, 1) f32
    # w2: (32, 64) bf16  | b2: (32, 1) f32
    # w3: (1, 32)  bf16  | b3: (1, 1)  f32   | o : (1, tb) f32
    x = x_ref[...]

    # Layer 1: (64,6) @ (6,tb) on the MXU, f32 accumulation; bias+ReLU in f32.
    h1 = jnp.dot(w1_ref[...], x, preferred_element_type=jnp.float32) + b1_ref[...]
    h1 = jnp.maximum(h1, 0.0)
    # TODO(synk): dropout(p=0.2) between layers only active in training mode.

    # Layer 2: (32,64) @ (64,tb).
    h2 = jnp.dot(w2_ref[...], h1.astype(jnp.bfloat16),
                 preferred_element_type=jnp.float32) + b2_ref[...]
    h2 = jnp.maximum(h2, 0.0)

    # Layer 3: (1,32) @ (32,tb) — result is already lane-dense.
    h3 = jnp.dot(w3_ref[...], h2.astype(jnp.bfloat16),
                 preferred_element_type=jnp.float32) + b3_ref[...]
    o_ref[...] = jnp.maximum(h3, 0.0)


def mlp_forward(x, params, tb=DEFAULT_TB):
    """x: (B, 6) float array. Returns (B, 1) float32."""
    B = x.shape[0]
    tb_eff, b_pad = _pick_tiling(B, tb)
    grid = (b_pad // tb_eff,)

    # Batch goes onto the lane axis: (B, 6) -> (6, B_pad) bf16.
    x_t = x.astype(jnp.bfloat16).T
    if b_pad != B:
        x_t = jnp.pad(x_t, ((0, 0), (0, b_pad - B)))

    w1, b1 = params["w1"], params["b1"]
    w2, b2 = params["w2"], params["b2"]
    w3, b3 = params["w3"], params["b3"]

    flops = 2 * b_pad * (N_FEATURES * H1 + H1 * H2 + H2 * H3)
    bytes_accessed = (
        b_pad * N_FEATURES * 2                       # x (bf16)
        + b_pad * H3 * 4                             # output (f32)
        + (N_FEATURES * H1 + H1 * H2 + H2 * H3) * 2  # bf16 weights
        + (H1 + H2 + H3) * 4)                        # f32 biases

    out = pl.pallas_call(
        mlp_kernel,
        out_shape=jax.ShapeDtypeStruct((H3, b_pad), jnp.float32),
        grid=grid,
        in_specs=[
            pl.BlockSpec((N_FEATURES, tb_eff), lambda i: (0, i)),  # x streamed
            pl.BlockSpec((H1, N_FEATURES), lambda i: (0, 0)),      # weights resident
            pl.BlockSpec((H1, 1), lambda i: (0, 0)),
            pl.BlockSpec((H2, H1), lambda i: (0, 0)),
            pl.BlockSpec((H2, 1), lambda i: (0, 0)),
            pl.BlockSpec((H3, H2), lambda i: (0, 0)),
            pl.BlockSpec((H3, 1), lambda i: (0, 0)),
        ],
        out_specs=pl.BlockSpec((H3, tb_eff), lambda i: (0, i)),
        compiler_params=pltpu.CompilerParams(
            dimension_semantics=("parallel",)),
        cost_estimate=pl.CostEstimate(
            flops=flops, transcendentals=0, bytes_accessed=bytes_accessed),
    )(x_t, w1, b1, w2, b2, w3, b3)

    return out[0, :B].reshape(B, H3)


def init_params(key):
    """PyTorch nn.Linear-style init (U[-1/sqrt(fan_in), +1/sqrt(fan_in)]).

    Weights are stored in the native nn.Linear layout (out_features, in_features),
    which is exactly what the transposed kernel consumes (h = W @ x)."""
    ks = jax.random.split(key, 6)

    def linear(kw, kb, fan_in, fan_out):
        bound = 1.0 / jnp.sqrt(jnp.float32(fan_in))
        w = jax.random.uniform(kw, (fan_out, fan_in), jnp.float32, -bound, bound)
        b = jax.random.uniform(kb, (fan_out, 1), jnp.float32, -bound, bound)
        return w, b

    w1, b1 = linear(ks[0], ks[1], N_FEATURES, H1)
    w2, b2 = linear(ks[2], ks[3], H1, H2)
    w3, b3 = linear(ks[4], ks[5], H2, H3)
    return {
        "w1": w1.astype(jnp.bfloat16), "b1": b1,
        "w2": w2.astype(jnp.bfloat16), "b2": b2,
        "w3": w3.astype(jnp.bfloat16), "b3": b3,
    }


def mlp_reference(x, p):
    """Pure-JAX reference with the same dtype strategy / math order as the kernel."""
    xt = x.astype(jnp.bfloat16).T                                            # (6, B)
    h1 = jnp.maximum(
        jnp.dot(p["w1"], xt, preferred_element_type=jnp.float32) + p["b1"], 0.0)
    h2 = jnp.maximum(
        jnp.dot(p["w2"], h1.astype(jnp.bfloat16),
                preferred_element_type=jnp.float32) + p["b2"], 0.0)
    h3 = jnp.maximum(
        jnp.dot(p["w3"], h2.astype(jnp.bfloat16),
                preferred_element_type=jnp.float32) + p["b3"], 0.0)
    return h3.T                                                              # (B, 1)


if __name__ == "__main__":
    key = jax.random.PRNGKey(0)
    k_params, k_x = jax.random.split(key)

    params = init_params(k_params)
    B = 8
    x = jax.random.normal(k_x, (B, N_FEATURES), dtype=jnp.float32)

    out = jax.block_until_ready(mlp_forward(x, params))
    ref = mlp_reference(x, params)

    assert out.shape == (B, H3)
    assert jnp.allclose(out, ref, atol=1e-3, rtol=1e-3)

    print("KERNEL_OK")
</pallas_src>

<mosaic_0001>
module attributes {stable_mosaic.version = 11 : i64} {
  func.func @mlp_kernel(%arg0: i32, %arg1: memref<6x128xbf16, #tpu.memory_space<vmem>>, %arg2: memref<64x6xbf16, #tpu.memory_space<vmem>>, %arg3: memref<64x1xf32, #tpu.memory_space<vmem>>, %arg4: memref<32x64xbf16, #tpu.memory_space<vmem>>, %arg5: memref<32x1xf32, #tpu.memory_space<vmem>>, %arg6: memref<1x32xbf16, #tpu.memory_space<vmem>>, %arg7: memref<1x1xf32, #tpu.memory_space<vmem>>, %arg8: memref<1x128xf32, #tpu.memory_space<vmem>>) attributes {dimension_semantics = [#tpu.dimension_semantics<parallel>], iteration_bounds = array<i64: 2>, scalar_prefetch = 0 : i64, scratch_operands = 0 : i64, tpu.core_type = #tpu.core_type<tc>, window_params = [{transform_indices = @transform_0, window_bounds = array<i64: 6, 128>}, {pipeline_mode = #tpu.pipeline_mode<synchronous>, transform_indices = @transform_1, window_bounds = array<i64: 64, 6>}, {pipeline_mode = #tpu.pipeline_mode<synchronous>, transform_indices = @transform_2, window_bounds = array<i64: 64, 1>}, {pipeline_mode = #tpu.pipeline_mode<synchronous>, transform_indices = @transform_3, window_bounds = array<i64: 32, 64>}, {pipeline_mode = #tpu.pipeline_mode<synchronous>, transform_indices = @transform_4, window_bounds = array<i64: 32, 1>}, {pipeline_mode = #tpu.pipeline_mode<synchronous>, transform_indices = @transform_5, window_bounds = array<i64: 1, 32>}, {pipeline_mode = #tpu.pipeline_mode<synchronous>, transform_indices = @transform_6, window_bounds = array<i64: 1, 1>}, {transform_indices = @transform_7, window_bounds = array<i64: 1, 128>}]} {
    %c0 = arith.constant 0 : index
    %c0_0 = arith.constant 0 : index
    %0 = vector.load %arg1[%c0, %c0_0] : memref<6x128xbf16, #tpu.memory_space<vmem>>, vector<6x128xbf16>
    %c0_1 = arith.constant 0 : index
    %c0_2 = arith.constant 0 : index
    %1 = vector.load %arg2[%c0_1, %c0_2] : memref<64x6xbf16, #tpu.memory_space<vmem>>, vector<64x6xbf16>
    %cst = arith.constant dense<0.000000e+00> : vector<64x128xf32>
    %2 = tpu.matmul %1, %0, %cst {dimension_numbers = #tpu.dot_dimension_numbers<[1], [0], [0], [1], [0, 0, 1, 1], [], []>} : vector<64x6xbf16>, vector<6x128xbf16>, vector<64x128xf32> -> vector<64x128xf32>
    %c0_3 = arith.constant 0 : index
    %c0_4 = arith.constant 0 : index
    %3 = vector.load %arg3[%c0_3, %c0_4] : memref<64x1xf32, #tpu.memory_space<vmem>>, vector<64x1xf32>
    %4 = vector.broadcast %3 : vector<64x1xf32> to vector<64x128xf32>
    %5 = arith.addf %2, %4 : vector<64x128xf32>
    %cst_5 = arith.constant 0.000000e+00 : f32
    %6 = vector.broadcast %cst_5 : f32 to vector<64x128xf32>
    %7 = arith.maximumf %5, %6 : vector<64x128xf32>
    %c0_6 = arith.constant 0 : index
    %c0_7 = arith.constant 0 : index
    %8 = vector.load %arg4[%c0_6, %c0_7] : memref<32x64xbf16, #tpu.memory_space<vmem>>, vector<32x64xbf16>
    %9 = arith.truncf %7 : vector<64x128xf32> to vector<64x128xbf16>
    %cst_8 = arith.constant dense<0.000000e+00> : vector<32x128xf32>
    %10 = tpu.matmul %8, %9, %cst_8 {dimension_numbers = #tpu.dot_dimension_numbers<[1], [0], [0], [1], [0, 0, 1, 1], [], []>} : vector<32x64xbf16>, vector<64x128xbf16>, vector<32x128xf32> -> vector<32x128xf32>
    %c0_9 = arith.constant 0 : index
    %c0_10 = arith.constant 0 : index
    %11 = vector.load %arg5[%c0_9, %c0_10] : memref<32x1xf32, #tpu.memory_space<vmem>>, vector<32x1xf32>
    %12 = vector.broadcast %11 : vector<32x1xf32> to vector<32x128xf32>
    %13 = arith.addf %10, %12 : vector<32x128xf32>
    %cst_11 = arith.constant 0.000000e+00 : f32
    %14 = vector.broadcast %cst_11 : f32 to vector<32x128xf32>
    %15 = arith.maximumf %13, %14 : vector<32x128xf32>
    %c0_12 = arith.constant 0 : index
    %c0_13 = arith.constant 0 : index
    %16 = vector.load %arg6[%c0_12, %c0_13] : memref<1x32xbf16, #tpu.memory_space<vmem>>, vector<1x32xbf16>
    %17 = arith.truncf %15 : vector<32x128xf32> to vector<32x128xbf16>
    %cst_14 = arith.constant dense<0.000000e+00> : vector<1x128xf32>
    %18 = tpu.matmul %16, %17, %cst_14 {dimension_numbers = #tpu.dot_dimension_numbers<[1], [0], [0], [1], [0, 0, 1, 1], [], []>} : vector<1x32xbf16>, vector<32x128xbf16>, vector<1x128xf32> -> vector<1x128xf32>
    %c0_15 = arith.constant 0 : index
    %c0_16 = arith.constant 0 : index
    %19 = vector.load %arg7[%c0_15, %c0_16] : memref<1x1xf32, #tpu.memory_space<vmem>>, vector<1x1xf32>
    %20 = vector.broadcast %19 : vector<1x1xf32> to vector<1x128xf32>
    %21 = arith.addf %18, %20 : vector<1x128xf32>
    %cst_17 = arith.constant 0.000000e+00 : f32
    %22 = vector.broadcast %cst_17 : f32 to vector<1x128xf32>
    %23 = arith.maximumf %21, %22 : vector<1x128xf32>
    %c0_18 = arith.constant 0 : index
    %c0_19 = arith.constant 0 : index
    %24 = vector.load %arg8[%c0_18, %c0_19] : memref<1x128xf32, #tpu.memory_space<vmem>>, vector<1x128xf32>
    tpu.vector_store %arg8[%c0_18, %c0_19], %23 {strides = array<i32>} : memref<1x128xf32, #tpu.memory_space<vmem>>, vector<1x128xf32>,
    return
  }
  func.func @transform_0(%arg0: i32) -> (i32, i32) {
    %c0_i32 = arith.constant 0 : i32
    %c0_i32_0 = arith.constant 0 : i32
    return %c0_i32, %arg0 : i32, i32
  }
  func.func @transform_1(%arg0: i32) -> (i32, i32) {
    %c0_i32 = arith.constant 0 : i32
    %c0_i32_0 = arith.constant 0 : i32
    %c0_i32_1 = arith.constant 0 : i32
    return %c0_i32, %c0_i32_0 : i32, i32
  }
  func.func @transform_2(%arg0: i32) -> (i32, i32) {
    %c0_i32 = arith.constant 0 : i32
    %c0_i32_0 = arith.constant 0 : i32
    %c0_i32_1 = arith.constant 0 : i32
    return %c0_i32, %c0_i32_0 : i32, i32
  }
  func.func @transform_3(%arg0: i32) -> (i32, i32) {
    %c0_i32 = arith.constant 0 : i32
    %c0_i32_0 = arith.constant 0 : i32
    %c0_i32_1 = arith.constant 0 : i32
    return %c0_i32, %c0_i32_0 : i32, i32
  }
  func.func @transform_4(%arg0: i32) -> (i32, i32) {
    %c0_i32 = arith.constant 0 : i32
    %c0_i32_0 = arith.constant 0 : i32
    %c0_i32_1 = arith.constant 0 : i32
    return %c0_i32, %c0_i32_0 : i32, i32
  }
  func.func @transform_5(%arg0: i32) -> (i32, i32) {
    %c0_i32 = arith.constant 0 : i32
    %c0_i32_0 = arith.constant 0 : i32
    %c0_i32_1 = arith.constant 0 : i32
    return %c0_i32, %c0_i32_0 : i32, i32
  }
  func.func @transform_6(%arg0: i32) -> (i32, i32) {
    %c0_i32 = arith.constant 0 : i32
    %c0_i32_0 = arith.constant 0 : i32
    %c0_i32_1 = arith.constant 0 : i32
    return %c0_i32, %c0_i32_0 : i32, i32
  }
  func.func @transform_7(%arg0: i32) -> (i32, i32) {
    %c0_i32 = arith.constant 0 : i32
    %c0_i32_0 = arith.constant 0 : i32
    return %c0_i32, %arg0 : i32, i32
  }
}

</mosaic_0001>

<bundles_post_ra>
// kernel: tpu_custom_call.1
= control target key start
LH: loop header
LB: loop body
LE: loop exit
PB: predicated region body
PF: predicated region fallthrough
CT: control target
= control target key end

     0   :  { %s1062_s0 = inlined_call_operand.vmem [shape: bf16[6,256], index: 0, kind: input, shape index: {}]   ;;  %s1063_s1 = inlined_call_operand.vmem [shape: bf16[64,6], index: 1, kind: input, shape index: {}]   ;;  %s1064_s2 = inlined_call_operand.vmem [shape: f32[64,1], index: 2, kind: input, shape index: {}]   ;;  %s1065_s3 = inlined_call_operand.vmem [shape: bf16[32,64], index: 3, kind: input, shape index: {}]   ;;  %s1066_s4 = inlined_call_operand.vmem [shape: f32[32,1], index: 4, kind: input, shape index: {}]   ;;  %s1067_s5 = inlined_call_operand.vmem [shape: bf16[1,32], index: 5, kind: input, shape index: {}]   ;;  %s1068_s6 = inlined_call_operand.<no memory space> [shape: f32[1,1], index: 6, kind: input, shape index: {}]   ;;  %s1069_s7 = inlined_call_operand.hbm [shape: f32[1,256], index: 7, kind: output, shape index: {}]  }
   0x1   :  { %v12_v0 = vstv %s1068_s6 }
   0x2   :  { %13 = vst [vmem:[#allocation2] sm:$0x1] %v12_v0 }
   0x3   :  { %14 = vsyncpa [#allocation4], 0 }
   0x4   :  { %16 = vsyncpa [#allocation4 + $0x1], 0  ;;  %s899_s26 = smov 0   ;;  %s901_s27 = smov 0  }
   0x5   :  { %s903_s28 = smov 0   ;;  %s905_s29 = smov 0  }
   0x6 LB: > { %s920_s6 = sadd.s32 4294967295, %s850_s29   ;;  %s672_s30 = sadd.s32 4294967294, %s850_s29   ;;  %s850_s29 = sphi %s905_s29, %s1075_s29   ;;  %s846_s28 = sphi %s903_s28, %s1074_s28   ;;  %s842_s27 = sphi %s901_s27, %s1073_s27   ;;  %s838_s26 = sphi %s899_s26, %s1072_s26  }
   0x7   : > { %s924_s8 = sadd.s32 1, %s850_s29   ;;  %s181_s9 = sadd.s32 1, %s846_s28 }
   0x8   : > { %s178_s10 = ssub.s32 %s850_s29, %s924_s8  ;;  %p191_p0 = scmp.ne.s32.totalorder %s846_s28, %s842_s27 }
   0x9   : > { %p179_p1 = scmp.eq.s32.totalorder %s178_s10, 0  ;;  %p192_p2 = scmp.eq.s32.totalorder %s920_s6, 1 }
   0xa   : > { %p197_p3 = scmp.ne.s32.totalorder %s842_s27, %s838_s26  ;;  %p198_p4 = scmp.eq.s32.totalorder %s672_s30, 1 }
   0xb   : > { %s935_s11 = scalar_select %p179_p1, %s846_s28, %s181_s9  }
   0xc   : > { %p937_p5 = por %p192_p2, %p191_p0  ;;  %p941_p6 = por %p198_p4, %p197_p3 }
   0xd   : > { %p675_p7 = scmp.ge.s32.totalorder %s850_s29, 1  ;;  %p241_p8 = scmp.lt.s32.totalorder %s850_s29, 3 }
   0xf   : > { %p242_p9 = pnand %p675_p7, %p241_p8 }
  0x10   : > { %p271_p10 = scmp.lt.s32.totalorder (!%p242_p9), %s920_s6, 1  ;;  %v782_v1 = vld [vmem:[%s1063_s1] sm:$0xff] (!%p242_p9)   ;;  %vm353_vm0 = vcmask (!%p242_p9), 48128   ;;  %vm366_vm1 = vcmask (!%p242_p9), 1042432   ;;  %v852_v2 = vmov (!%p242_p9), 0   ;;  %v287_v4 = vld [vmem:[%s1064_s2 + $0x10] sm:$0xff] (!%p242_p9) }
  0x11   : > { %245 = sbr.rel (%p242_p9) target bundleno = 728 (0x2d8), region = 48  ;;  %709 = vmatprep.mubr.msk.bf16.mxu0 (!%p242_p9), %vm353_vm0, %v782_v1  ;;  %780 = vset.pattern.permute.xlu0 (!%p242_p9), %v852_v2  ;;  %v285_v3 = vld [vmem:[%s1064_s2] sm:$0xff] (!%p242_p9)  ;;  %v286_v6 = vld [vmem:[%s1064_s2 + $0x8] sm:$0xff] (!%p242_p9)  ;;  %v288_v9 = vld [vmem:[%s1064_s2 + $0x18] sm:$0xff] (!%p242_p9)  ;;  %vm485_vm2 = vcmask (!%p242_p9), 523264   ;;  %v853_v59 = vmov (!%p242_p9), 0.0  }
  0x12   : > { %781 = vset.pattern.permute.xlu1 (!%p242_p9), %v852_v2  ;;  %295 = vperm.xlu0 (!%p242_p9), %780, %v285_v3   ;;  %v783_v8 = vld [vmem:[%s1063_s1 + $0x8] sm:$0xff] (!%p242_p9)   ;;  %v784_v10 = vld [vmem:[%s1063_s1 + $0x10] sm:$0xff] (!%p242_p9)   ;;  %v289_v11 = vld [vmem:[%s1064_s2 + $0x20] sm:$0xff] (!%p242_p9)  ;;  %vm854_vm3 = vmmov (!%p242_p9), 0   ;;  %vm558_vm4 = vcmask (!%p242_p9), 261120   ;;  %s269_s9 = sand.u32 (!%p242_p9), 1, %s842_s27  }
  0x13   : > { %305 = vperm.xlu1 (!%p242_p9), %781, %v287_v4   ;;  %v290_v12 = vld [vmem:[%s1064_s2 + $0x28] sm:$0xff] (!%p242_p9)  ;;  %v291_v13 = vld [vmem:[%s1064_s2 + $0x30] sm:$0xff] (!%p242_p9)  ;;  %v785_v14 = vld [vmem:[%s1063_s1 + $0x18] sm:$0xff] (!%p242_p9)   ;;  %s690_s10 = sshll.u32 (!%p242_p9), %s920_s6, 4  ;;  %s270_s14 = scalar_lea.vmem (!%p242_p9), [#allocation3], %s269_s9 }
  0x14   : > { %v292_v15 = vld [vmem:[%s1064_s2 + $0x38] sm:$0xff] (!%p242_p9)  ;;  %v451_v16 = vld [vmem:[%s1066_s4] sm:$0xff] (!%p242_p9)  ;;  %v452_v17 = vld [vmem:[%s1066_s4 + $0x8] sm:$0xff] (!%p242_p9)  ;;  %s617_s15 = sshll.u32 (!%p242_p9), %s270_s14, 4  ;;  %s1020_s18 = scalar_lea.hbm (!%p242_p9), %s1069_s7, %s690_s10  ;;  %s1022_s15 = int_to_ptr.vmem [resolvable:$true] %s617_s15 }
  0x15   : > { %v453_v18 = vld [vmem:[%s1066_s4 + $0x10] sm:$0xff] (!%p242_p9)  ;;  %v454_v19 = vld [vmem:[%s1066_s4 + $0x18] sm:$0xff] (!%p242_p9)  ;;  %v548_v20 = vld [vmem:[#allocation2] sm:$0x1] (!%p242_p9)  ;;  %s605_s19 = scalar_lea.sflag (!%p242_p9), [#allocation4], %s269_s9  ;;  %s855_s20 = smov (!%p242_p9), [#allocation3]  }
  0x16   : > { %300 = vperm.xlu0 (!%p242_p9), %780, %v286_v6   ;;  %v786_v21 = vld [vmem:[%s1065_s3] sm:$0xff] (!%p242_p9)   ;;  %v787_v58 = vld [vmem:[%s1065_s3 + $0x8] sm:$0xff] (!%p242_p9)   ;;  %s792_s21 = sshll.u32 (!%p242_p9), %s855_s20, 4  ;;  %s793_s21 = int_to_ptr.vmem [resolvable:$false] %s792_s21 }
  0x17   : > { %310 = vperm.xlu1 (!%p242_p9), %781, %v288_v9   ;;  %725 = vmatprep.mubr.msk.bf16.mxu1 (!%p242_p9), %vm485_vm2, %v786_v21  ;;  %p795_p0 = scmp.lt.s32.totalorder (!%p242_p9), %s1022_s15, %s793_s21 }
  0x18   : > { %s272_s16 = scalar_select %p271_p10, %s920_s6, 1 }
  0x19   : > { %s788_s6 = scalar_lea.vmem %s1022_s15, 16 }
  0x1a   : > { %s676_s17 = sshll.u32 %s272_s16, 2  ;;  %315 = vperm.xlu0 %780, %v289_v11   ;;  %p789_p11 = scmp.ne.s32.totalorder %s1022_s15, %s788_s6 }
  0x1b   : > { %s274_s22 = scalar_lea.vmem %s1062_s0, %s676_s17  ;;  %320 = vperm.xlu1 %781, %v290_v12  }
  0x1c   : > { %v276_v5 = vld [vmem:[%s274_s22] sm:$0x7]  ;;  %p790_p12 = pnand %p789_p11, %p937_p5  ;;  %s794_s22 = scalar_lea.vmem %s793_s21, 32 }
  0x1d   : > { %737 = vmatprep.subr.msk.bf16.mxu0 %vm366_vm1, %v276_v5  ;;  %v368_v7 = vsel %vm366_vm1, %v276_v5, 0  ;;  %p796_p1 = scmp.lt.s32.totalorder %s794_s22, %s788_s6 }
  0x1e   : > { %708 = vmatpush3.bf16.msra.mxu0 %v368_v7  ;;  %325 = vperm.xlu0 %780, %v291_v13   ;;  %p791_p13 = pneg %p790_p12 }
  0x1f   : > { %330 = vperm.xlu1 %781, %v292_v15   ;;  %729 = vmatprep.subr.bf16.mxu0 %v853_v59  ;;  %v554_v15 = vlaneseq  ;;  %p797_p2 = por %p796_p1, %p795_p0 }
  0x21   : > { %710 = vmatmul.mubr.msk.bf16.vlgmr.msra.gmra.mrb[0].mxu0 %vm353_vm0, %v783_v8  ;;  %p798_p3 = pnand %p797_p2, %p791_p13 }
  0x22   : > { %713 = vmatprep.mubr.msk.bf16.mxu0 %vm353_vm0, %v784_v10  ;;  %457 = vperm.xlu0 %780, %v451_v16   ;;  %v555_v16 = vshrl.u32 %v554_v15, 7 }
  0x23   : > { %462 = vperm.xlu1 %781, %v452_v17  }
  0x24   : > { %v556_v17 = vsub.s32 0, %v555_v16 }
  0x26   : > { %467 = vperm.xlu0 %780, %v453_v18  }
  0x27   : > { %472 = vperm.xlu1 %781, %v454_v19  }
  0x29   : > { %714 = vmatmul.mubr.msk.bf16.gmra.mrb[4].mxu0 %vm353_vm0, %v785_v14  ;;  %v545_v14 = vld [vmem:[%s1067_s5] sm:$0x1] }
  0x2a   : > { %551 = vperm.xlu0 %780, %v548_v20   ;;  %733 = vmatprep.mubr.msk.bf16.mxu0 %vm854_vm3, %v853_v59 }
  0x91   : > { %v296_v22 = vpop.permute.xlu0 %295 }
  0x92   : > { %v306_v23 = vpop.permute.xlu1 %305 }
  0x95   : > { %v301_v24 = vpop.permute.xlu0 %300 }
  0x96   : > { %v311_v25 = vpop.permute.xlu1 %310 }
  0x99   : > { %v316_v29 = vpop.permute.xlu0 %315 }
  0x9a   : > { %v321_v34 = vpop.permute.xlu1 %320 }
  0x9d   : > { %v326_v41 = vpop.permute.xlu0 %325 }
  0x9e   : > { %v331_v46 = vpop.permute.xlu1 %330 }
  0xa1   : > { %v458_v60 = vpop.permute.xlu0 %457 }
  0xa2   : > { %v463_v61 = vpop.permute.xlu1 %462 }
  0xa5   : > { %v468_v62 = vpop.permute.xlu0 %467 }
  0xa6   : > { %v473_v2 = vpop.permute.xlu1 %472 }
  0xa9   : > { %v552_v18 = vpop.permute.xlu0 %551 }
  0xaa   : > { %v557_v19 = vrot.slane %v552_v18, %v556_v17 }
  0xf4   : > { %v711_v26 = vpop.f32.mrb[0].mxu0 }
  0xf5   : > { %v413_v27 = vadd.f32 %v711_v26, %v306_v23  ;;  %v404_v28 = vpop.f32.mrb[1].mxu0 }
  0xf6   : > { %v405_v30 = vadd.f32 %v404_v28, %v296_v22  ;;  %v712_v31 = vpop.f32.mrb[2].mxu0 }
  0xf7   : > { %v416_v32 = vadd.f32 %v712_v31, %v311_v25  ;;  %v407_v33 = vpop.f32.mrb[3].mxu0  ;;  %v437_v36 = vmax.f32 %v413_v27, 0.0 }
  0xf8   : > { %v408_v35 = vadd.f32 %v407_v33, %v301_v24  ;;  %v435_v38 = vmax.f32 %v405_v30, 0.0 }
  0xf9   : > { %v438_v37 = vmax.f32 %v416_v32, 0.0 }
  0xfa   : > { %v436_v39 = vmax.f32 %v408_v35, 0.0 }
  0xfb   : > { %v448_v40 = vpack.c.bf16 %v438_v37, %v437_v36 }
  0xfc   : > { %v715_v42 = vpop.f32.mrb[4].mxu0  ;;  %v447_v43 = vpack.c.bf16 %v436_v39, %v435_v38 }
  0xfd   : > { %v429_v44 = vadd.f32 %v715_v42, %v326_v41  ;;  %v420_v45 = vpop.f32.mrb[5].mxu0 }
  0xfe   : > { %v421_v47 = vadd.f32 %v420_v45, %v316_v29  ;;  %v716_v48 = vpop.f32.mrb[6].mxu0  ;;  %717 = vmatprep.subr.bf16.mxu1 %v447_v43 }
  0xff   : > { %v432_v49 = vadd.f32 %v716_v48, %v331_v46  ;;  %v423_v50 = vpop.f32.mrb[7].mxu0  ;;  %718 = vmatpush3.bf16.msra.mxu1 %v447_v43  ;;  %v441_v52 = vmax.f32 %v429_v44, 0.0 }
 0x100   : > { %v424_v51 = vadd.f32 %v423_v50, %v321_v34  ;;  %719 = vmatprep.subr.bf16.mxu1 %v448_v40  ;;  %v439_v54 = vmax.f32 %v421_v47, 0.0 }
 0x101   : > { %v442_v53 = vmax.f32 %v432_v49, 0.0 }
 0x102   : > { %v440_v55 = vmax.f32 %v424_v51, 0.0 }
 0x103   : > { %v450_v56 = vpack.c.bf16 %v442_v53, %v441_v52  ;;  %720 = vmatpush3.bf16.msra.mxu1 %v448_v40 }
 0x104   : > { %v449_v57 = vpack.c.bf16 %v440_v55, %v439_v54 }
 0x106   : > { %721 = vmatprep.subr.bf16.mxu1 %v449_v57 }
 0x107   : > { %722 = vmatpush3.bf16.msra.mxu1 %v449_v57 }
 0x108   : > { %723 = vmatprep.subr.bf16.mxu1 %v450_v56 }
 0x10b   : > { %724 = vmatpush3.bf16.msra.mxu1 %v450_v56 }
 0x10e   : > { %726 = vmatmul.mubr.msk.bf16.vlgmr.msra.gmra.mrb[0].mxu1 %vm485_vm2, %v787_v58 }
 0x1e1   : > { %v727_v63 = vpop.f32.mrb[0].mxu1 }
 0x1e2   : > { %v535_v0 = vadd.f32 %v727_v63, %v468_v62  ;;  %v526_v1 = vpop.f32.mrb[1].mxu1 }
 0x1e3   : > { %v527_v3 = vadd.f32 %v526_v1, %v458_v60  ;;  %v728_v4 = vpop.f32.mrb[2].mxu1 }
 0x1e4   : > { %v538_v5 = vadd.f32 %v728_v4, %v473_v2  ;;  %v529_v6 = vpop.f32.mrb[3].mxu1  ;;  %v543_v8 = vmax.f32 %v535_v0, 0.0 }
 0x1e5   : > { %v530_v7 = vadd.f32 %v529_v6, %v463_v61  ;;  %v541_v10 = vmax.f32 %v527_v3, 0.0 }
 0x1e6   : > { %v544_v9 = vmax.f32 %v538_v5, 0.0 }
 0x1e7   : > { %v542_v11 = vmax.f32 %v530_v7, 0.0 }
 0x1e8   : > { %v547_v12 = vpack.c.bf16 %v544_v9, %v543_v8 }
 0x1e9   : > { %v546_v13 = vpack.c.bf16 %v542_v11, %v541_v10 }
 0x1eb   : > { %730 = vmatpush3.bf16.msra.mxu0 %v546_v13 }
 0x1ec   : > { %731 = vmatprep.subr.bf16.mxu0 %v853_v59 }
 0x1ef   : > { %732 = vmatpush3.bf16.msra.mxu0 %v547_v12 }
 0x1f2   : > { %734 = vmatmul.mubr.msk.bf16.vlgmr.msra.gmra.mrb[8].mxu0 %vm558_vm4, %v545_v14 }
 0x2c5   : > { %v596_v20 = vpop.f32.mrb[8].mxu0 }
 0x2c6   : > { %v597_v21 = vadd.f32 %v596_v20, %v557_v19  ;;  %v735_v22 = vpop.f32.mrb[9].mxu0 }
 0x2c7   : > { %v599_v23 = vpop.f32.mrb[10].mxu0 }
 0x2c8   : > { %v602_v24 = vmax.f32 %v597_v21, 0.0  ;;  %v736_v25 = vpop.f32.mrb[11].mxu0 }
 0x2ca   : > { %603 = vst [vmem:[%s270_s14] sm:$0x1] %v602_v24 }
 0x2cb   : > { %801 = shalt.err (!%p798_p3)
}
 0x2cc   : > { %s802_s23 = scalar_lea.hbm %s1020_s18, 16  ;;  %s806_s30 = scalar_lea.hbm %s1069_s7, 32 }
 0x2cd   : > { %p803_p4 = scmp.ne.s32.totalorder %s1020_s18, %s802_s23  ;;  %p807_p9 = scmp.lt.u32.totalorder %s1020_s18, %s1069_s7 }
 0x2ce   : > { %p808_p10 = scmp.lt.u32.totalorder %s806_s30, %s802_s23  ;;  %p810_p12 = scmp.lt.u32.totalorder %s802_s23, %s1020_s18 }
 0x2cf   : > { %p804_p7 = pnand %p803_p4, %p937_p5 }
 0x2d0   : > { %p809_p11 = por %p808_p10, %p807_p9 }
 0x2d1   : > { %p805_p8 = pneg %p804_p7 }
 0x2d2   : > { %p811_p13 = por %p810_p12, %p809_p11 }
 0x2d4   : > { %p812_p0 = pnand %p811_p13, %p805_p8 }
 0x2d6   : > { %815 = shalt.err (!%p812_p0)
}
 0x2d7   : > { %738 = dma.vmem_to_hbm [thread:$0]  (%p937_p5), %s1022_s15, 16, %s1020_s18, %s605_s19  }
 0x2d8 PF: > { %p744_p1 = scmp.ge.s32.totalorder %s850_s29, 2  ;;  %s629_s14 = sand.u32 1, %s838_s26  }
 0x2d9   : > { %s630_s16 = scalar_lea.sflag [#allocation4], %s629_s14 }
 0x2da   : > { %p741_p2 = pnand %p744_p1, %p941_p6 }
 0x2dc   : > { %833 = dma.done.wait (!%p741_p2), %s630_s16, 16  }
 0x2dd   : > { %835 = vsyncadd (!%p741_p2), %s630_s16, 4294967280  ;;  %p19_p3 = scmp.ge.s32.totalorder %s924_s8, 4   ;;  %s1072_s26 = smov %s842_s27 }
 0x2de   : > { %s1073_s27 = smov %s846_s28  ;;  %s1074_s28 = smov %s935_s11 }
 0x2df   : > { %s1075_s29 = smov %s924_s8  ;;  %21 = sbr.rel (!%p19_p3) target bundleno = 6 (0x6), region = 83 }
 0x2e6   :  { %634 = vsyncpa [#allocation4], 1 }
 0x2e7   :  { %636 = vsyncpa [#allocation4 + $0x1], 1 }

</bundles_post_ra>
